<compile_context>
chip_gen: v7x
topology: tpu7x:2x2x1
jax: 0.10.0
libtpu: 0.0.40
codegen_flags: <defaults>
</compile_context>

<pallas_src>
import jax
import jax.numpy as jnp
from jax.experimental import pallas as pl
from jax.experimental.pallas import tpu as pltpu


def deep_cbow_kernel(ids_ref, img_ref, table_ref, w1t_emb_ref, w1t_img_ref,
                     b1_ref, w2t_ref, b2_ref, out_ref):
    # ids_ref     : (TB, L)        int32 token ids for this batch tile
    # img_ref     : (TB*R, F)      bf16 image-region features, regions in M
    # table_ref   : (V_pad, E)     bf16 embedding table (PAD row = 0, lane-padded V)
    # w1t_emb_ref : (E, H)         bf16 linear1 weight, embedding columns (transposed)
    # w1t_img_ref : (F, H)         bf16 linear1 weight, image columns (transposed)
    # b1_ref      : (1, H)         f32
    # w2t_ref     : (H, O_pad)     bf16 linear2 weight (transposed, zero-padded lanes)
    # b2_ref      : (1, O_pad)     f32
    # out_ref     : (TB*R, O_pad)  f32 lane-dense output block
    tb, seq_len = ids_ref.shape
    tbr = img_ref.shape[0]
    r = tbr // tb
    v_pad = table_ref.shape[0]

    # --- CBOW embedding lookup + sum as a one-hot counts matmul ------------
    ids = ids_ref[...]                                              # (TB, L) int32
    vocab_iota = jax.lax.broadcasted_iota(jnp.int32, (tb, v_pad), 1)
    counts = jnp.zeros((tb, v_pad), jnp.float32)
    for l in range(seq_len):                                        # L is small & static
        counts = counts + jnp.where(ids[:, l:l + 1] == vocab_iota, 1.0, 0.0)
    # PAD embedding row is zero, so pad tokens contribute nothing.
    emb_sum = jnp.dot(counts.astype(jnp.bfloat16), table_ref[...],
                      preferred_element_type=jnp.float32)           # (TB, E)

    # --- split linear1: per-sentence half (done once, not once per region) --
    h_emb = jnp.dot(emb_sum.astype(jnp.bfloat16), w1t_emb_ref[...],
                    preferred_element_type=jnp.float32)             # (TB, H)
    # per-region half
    h_img = jnp.dot(img_ref[...], w1t_img_ref[...],
                    preferred_element_type=jnp.float32)             # (TB*R, H)

    # Broadcast h_emb over the R regions of each sentence with a tiny 0/1
    # selector matmul (stays 2-D / tile-aligned; avoids a (TB, 10, H) relayout).
    row = jax.lax.broadcasted_iota(jnp.int32, (tbr, tb), 0)
    col = jax.lax.broadcasted_iota(jnp.int32, (tbr, tb), 1)
    sel = jnp.where((row >= col * r) & (row < (col + 1) * r), 1.0, 0.0)
    h_emb_b = jnp.dot(sel.astype(jnp.bfloat16), h_emb.astype(jnp.bfloat16),
                      preferred_element_type=jnp.float32)           # (TB*R, H)

    # bias add + tanh in f32 (v5e VPU/EUP have no bf16)
    h = jnp.tanh(h_img + h_emb_b + b1_ref[...])                     # (TB*R, H)

    # linear2 into the lane-dense (padded) output.
    out = jnp.dot(h.astype(jnp.bfloat16), w2t_ref[...],
                  preferred_element_type=jnp.float32) + b2_ref[...]
    out_ref[...] = out.astype(out_ref.dtype)


def prepare_params(params, *, num_regions=10):
    """One-time, per-model weight preparation (transpose / pad / bf16 cast)."""
    emb = params['embedding']                  # (V, E)   PAD row already zeroed
    w1 = params['w1']                          # (H, E + F)  PyTorch layout
    b1 = params['b1']                          # (H,)
    w2 = params['w2']                          # (O, H)
    b2 = params['b2']                          # (O,)

    V, E = emb.shape
    H = w1.shape[0]
    F = w1.shape[1] - E
    O = w2.shape[0]

    # Embedding table: pad vocab up to a lane multiple with zero rows.
    V_pad = max(128, ((V + 127) // 128) * 128)
    table = (jnp.zeros((V_pad, E), jnp.float32).at[:V].set(emb)
             .astype(jnp.bfloat16))

    # Linear1, transposed and split into embedding / image column blocks
    # (column order [emb | img] matches cat([embeds, img_feat], dim=2)).
    w1t = jnp.transpose(w1)                                         # (E+F, H)
    w1t_emb = w1t[:E].astype(jnp.bfloat16)                          # (E, H)
    w1t_img = w1t[E:].astype(jnp.bfloat16)                          # (F, H)
    b1_2d = b1.reshape(1, H).astype(jnp.float32)

    # Linear2, transposed and zero-padded to a lane-dense output width.
    O_pad = max(128, ((O + 127) // 128) * 128)
    w2t_pad = (jnp.zeros((H, O_pad), jnp.float32)
               .at[:, :O].set(jnp.transpose(w2)).astype(jnp.bfloat16))
    b2_pad = jnp.zeros((1, O_pad), jnp.float32).at[0, :O].set(b2)

    dims = dict(V=V, V_pad=V_pad, E=E, F=F, H=H, O=O, O_pad=O_pad,
                R=num_regions)
    return dict(table=table, w1t_emb=w1t_emb, w1t_img=w1t_img, b1=b1_2d,
                w2t=w2t_pad, b2=b2_pad, dims=dims)


def deep_cbow_forward(inputs, img_feat, prep, *, batch_tile=None):
    """inputs: (B, L) int32 token ids; img_feat: (B, R, F) float32."""
    d = prep['dims']
    B, L = inputs.shape
    _, R, F = img_feat.shape
    assert R == d['R'] and F == d['F'], (R, F, d)
    E, H, O, O_pad, V_pad = d['E'], d['H'], d['O'], d['O_pad'], d['V_pad']

    # Flatten image regions into the matmul M dimension; bf16 MXU operands.
    img_flat = img_feat.reshape(B * R, F).astype(jnp.bfloat16)       # (B*R, F)

    # Batch tiling.  Default: one fat step (grid=(1,)) — at small/medium B the
    # per-step pipeline overhead dominates, so fewer/fatter steps win.  For
    # large B pick a tile whose double-buffered img+out blocks plus resident
    # weights stay well inside v7x's 32 MiB scoped VMEM default
    # (~0.7 KB/row => a few thousand rows per tile is plenty).
    tb = B if batch_tile is None else batch_tile
    assert B % tb == 0 and (tb == B or tb % 8 == 0), (B, tb)
    grid = (B // tb,)

    out_flat = pl.pallas_call(
        deep_cbow_kernel,
        out_shape=jax.ShapeDtypeStruct((B * R, O_pad), jnp.float32),
        grid=grid,
        in_specs=[
            pl.BlockSpec((tb, L), lambda i: (i, 0)),          # token ids
            pl.BlockSpec((tb * R, F), lambda i: (i, 0)),      # image features
            pl.BlockSpec((V_pad, E), lambda i: (0, 0)),       # embedding table
            pl.BlockSpec((E, H), lambda i: (0, 0)),           # W1 (emb cols)
            pl.BlockSpec((F, H), lambda i: (0, 0)),           # W1 (img cols)
            pl.BlockSpec((1, H), lambda i: (0, 0)),           # b1
            pl.BlockSpec((H, O_pad), lambda i: (0, 0)),       # W2
            pl.BlockSpec((1, O_pad), lambda i: (0, 0)),       # b2
        ],
        out_specs=pl.BlockSpec((tb * R, O_pad), lambda i: (i, 0)),
        compiler_params=pltpu.CompilerParams(
            dimension_semantics=("parallel",)),
    )(inputs.astype(jnp.int32), img_flat, prep['table'], prep['w1t_emb'],
      prep['w1t_img'], prep['b1'], prep['w2t'], prep['b2'])

    # Strip the lane padding and restore (B, R, O).
    return out_flat[:, :O].reshape(B, R, O)


def reference_forward(inputs, img_feat, params):
    """Pure-JAX f32 reference mirroring the PyTorch forward exactly."""
    emb = params['embedding'][inputs]               # (B, L, E)
    emb = jnp.sum(emb, axis=1)                      # (B, E)
    emb = emb[:, None, :]                           # (B, 1, E)
    emb = jnp.tile(emb, (1, 10, 1))                 # (B, 10, E)
    emb_feat = jnp.concatenate([emb, img_feat], axis=2)
    h = jnp.tanh(emb_feat @ params['w1'].T + params['b1'])
    return h @ params['w2'].T + params['b2']


if __name__ == "__main__":
    # Small, deterministic configuration.
    vocab_size, embedding_dim, img_feat_dim = 50, 32, 16
    hidden_dim, output_dim = 32, 5
    PAD = 0
    B, L, R = 16, 8, 10

    key = jax.random.PRNGKey(0)
    k_emb, k_w1, k_b1, k_w2, k_b2, k_tok, k_img = jax.random.split(key, 7)

    embedding = jax.random.normal(k_emb, (vocab_size, embedding_dim),
                                  dtype=jnp.float32) * 0.1
    embedding = embedding.at[PAD].set(0.0)          # padding_idx row zeroed
    params = {
        'embedding': embedding,
        'w1': jax.random.normal(
            k_w1, (hidden_dim, embedding_dim + img_feat_dim),
            dtype=jnp.float32) * 0.1,
        'b1': jax.random.normal(k_b1, (hidden_dim,), dtype=jnp.float32) * 0.1,
        'w2': jax.random.normal(k_w2, (output_dim, hidden_dim),
                                dtype=jnp.float32) * 0.1,
        'b2': jax.random.normal(k_b2, (output_dim,), dtype=jnp.float32) * 0.1,
    }

    inputs = jax.random.randint(k_tok, (B, L), 0, vocab_size, dtype=jnp.int32)
    inputs = inputs.at[:, -2:].set(PAD)             # a couple of pad tokens
    img_feat = jax.random.normal(k_img, (B, R, img_feat_dim),
                                 dtype=jnp.float32)

    prep = prepare_params(params, num_regions=R)    # one-time weight prep

    out = deep_cbow_forward(inputs, img_feat, prep)  # grid=(1,) for B=16
    out = jax.block_until_ready(out)

    ref = reference_forward(inputs, img_feat, params)
    assert out.shape == (B, R, output_dim)
    # bf16 MXU operands vs f32 reference -> looser tolerance.
    assert jnp.allclose(out, ref, atol=2e-2, rtol=2e-2), (
        float(jnp.max(jnp.abs(out - ref))))

    print("KERNEL_OK")
</pallas_src>

<mosaic_0001>
module attributes {stable_mosaic.version = 11 : i64} {
  func.func @deep_cbow_kernel(%arg0: i32, %arg1: memref<16x8xi32, #tpu.memory_space<vmem>>, %arg2: memref<160x16xbf16, #tpu.memory_space<vmem>>, %arg3: memref<128x32xbf16, #tpu.memory_space<vmem>>, %arg4: memref<32x32xbf16, #tpu.memory_space<vmem>>, %arg5: memref<16x32xbf16, #tpu.memory_space<vmem>>, %arg6: memref<1x32xf32, #tpu.memory_space<vmem>>, %arg7: memref<32x128xbf16, #tpu.memory_space<vmem>>, %arg8: memref<1x128xf32, #tpu.memory_space<vmem>>, %arg9: memref<160x128xf32, #tpu.memory_space<vmem>>) attributes {dimension_semantics = [#tpu.dimension_semantics<parallel>], iteration_bounds = array<i64: 1>, scalar_prefetch = 0 : i64, scratch_operands = 0 : i64, tpu.core_type = #tpu.core_type<tc>, window_params = [{transform_indices = @transform_0, window_bounds = array<i64: 16, 8>}, {transform_indices = @transform_1, window_bounds = array<i64: 160, 16>}, {pipeline_mode = #tpu.pipeline_mode<synchronous>, transform_indices = @transform_2, window_bounds = array<i64: 128, 32>}, {pipeline_mode = #tpu.pipeline_mode<synchronous>, transform_indices = @transform_3, window_bounds = array<i64: 32, 32>}, {pipeline_mode = #tpu.pipeline_mode<synchronous>, transform_indices = @transform_4, window_bounds = array<i64: 16, 32>}, {pipeline_mode = #tpu.pipeline_mode<synchronous>, transform_indices = @transform_5, window_bounds = array<i64: 1, 32>}, {pipeline_mode = #tpu.pipeline_mode<synchronous>, transform_indices = @transform_6, window_bounds = array<i64: 32, 128>}, {pipeline_mode = #tpu.pipeline_mode<synchronous>, transform_indices = @transform_7, window_bounds = array<i64: 1, 128>}, {transform_indices = @transform_8, window_bounds = array<i64: 160, 128>}]} {
    %c0 = arith.constant 0 : index
    %c0_0 = arith.constant 0 : index
    %0 = vector.load %arg1[%c0, %c0_0] : memref<16x8xi32, #tpu.memory_space<vmem>>, vector<16x8xi32>
    %1 = tpu.iota {dimensions = array<i32: 1>} : vector<16x128xi32>
    %cst = arith.constant 0.000000e+00 : f32
    %2 = vector.broadcast %cst : f32 to vector<16x128xf32>
    %3 = vector.extract_strided_slice %0 {offsets = [0, 0], sizes = [16, 1], strides = [1, 1]} : vector<16x8xi32> to vector<16x1xi32>
    %4 = vector.broadcast %3 : vector<16x1xi32> to vector<16x128xi32>
    %5 = arith.cmpi eq, %4, %1 : vector<16x128xi32>
    %cst_1 = arith.constant 1.000000e+00 : f32
    %cst_2 = arith.constant 0.000000e+00 : f32
    %6 = vector.broadcast %cst_1 : f32 to vector<16x128xf32>
    %7 = vector.broadcast %cst_2 : f32 to vector<16x128xf32>
    %8 = arith.select %5, %6, %7 : vector<16x128xi1>, vector<16x128xf32>
    %9 = arith.addf %2, %8 : vector<16x128xf32>
    %10 = vector.extract_strided_slice %0 {offsets = [0, 1], sizes = [16, 1], strides = [1, 1]} : vector<16x8xi32> to vector<16x1xi32>
    %11 = vector.broadcast %10 : vector<16x1xi32> to vector<16x128xi32>
    %12 = arith.cmpi eq, %11, %1 : vector<16x128xi32>
    %cst_3 = arith.constant 1.000000e+00 : f32
    %cst_4 = arith.constant 0.000000e+00 : f32
    %13 = vector.broadcast %cst_3 : f32 to vector<16x128xf32>
    %14 = vector.broadcast %cst_4 : f32 to vector<16x128xf32>
    %15 = arith.select %12, %13, %14 : vector<16x128xi1>, vector<16x128xf32>
    %16 = arith.addf %9, %15 : vector<16x128xf32>
    %17 = vector.extract_strided_slice %0 {offsets = [0, 2], sizes = [16, 1], strides = [1, 1]} : vector<16x8xi32> to vector<16x1xi32>
    %18 = vector.broadcast %17 : vector<16x1xi32> to vector<16x128xi32>
    %19 = arith.cmpi eq, %18, %1 : vector<16x128xi32>
    %cst_5 = arith.constant 1.000000e+00 : f32
    %cst_6 = arith.constant 0.000000e+00 : f32
    %20 = vector.broadcast %cst_5 : f32 to vector<16x128xf32>
    %21 = vector.broadcast %cst_6 : f32 to vector<16x128xf32>
    %22 = arith.select %19, %20, %21 : vector<16x128xi1>, vector<16x128xf32>
    %23 = arith.addf %16, %22 : vector<16x128xf32>
    %24 = vector.extract_strided_slice %0 {offsets = [0, 3], sizes = [16, 1], strides = [1, 1]} : vector<16x8xi32> to vector<16x1xi32>
    %25 = vector.broadcast %24 : vector<16x1xi32> to vector<16x128xi32>
    %26 = arith.cmpi eq, %25, %1 : vector<16x128xi32>
    %cst_7 = arith.constant 1.000000e+00 : f32
    %cst_8 = arith.constant 0.000000e+00 : f32
    %27 = vector.broadcast %cst_7 : f32 to vector<16x128xf32>
    %28 = vector.broadcast %cst_8 : f32 to vector<16x128xf32>
    %29 = arith.select %26, %27, %28 : vector<16x128xi1>, vector<16x128xf32>
    %30 = arith.addf %23, %29 : vector<16x128xf32>
    %31 = vector.extract_strided_slice %0 {offsets = [0, 4], sizes = [16, 1], strides = [1, 1]} : vector<16x8xi32> to vector<16x1xi32>
    %32 = vector.broadcast %31 : vector<16x1xi32> to vector<16x128xi32>
    %33 = arith.cmpi eq, %32, %1 : vector<16x128xi32>
    %cst_9 = arith.constant 1.000000e+00 : f32
    %cst_10 = arith.constant 0.000000e+00 : f32
    %34 = vector.broadcast %cst_9 : f32 to vector<16x128xf32>
    %35 = vector.broadcast %cst_10 : f32 to vector<16x128xf32>
    %36 = arith.select %33, %34, %35 : vector<16x128xi1>, vector<16x128xf32>
    %37 = arith.addf %30, %36 : vector<16x128xf32>
    %38 = vector.extract_strided_slice %0 {offsets = [0, 5], sizes = [16, 1], strides = [1, 1]} : vector<16x8xi32> to vector<16x1xi32>
    %39 = vector.broadcast %38 : vector<16x1xi32> to vector<16x128xi32>
    %40 = arith.cmpi eq, %39, %1 : vector<16x128xi32>
    %cst_11 = arith.constant 1.000000e+00 : f32
    %cst_12 = arith.constant 0.000000e+00 : f32
    %41 = vector.broadcast %cst_11 : f32 to vector<16x128xf32>
    %42 = vector.broadcast %cst_12 : f32 to vector<16x128xf32>
    %43 = arith.select %40, %41, %42 : vector<16x128xi1>, vector<16x128xf32>
    %44 = arith.addf %37, %43 : vector<16x128xf32>
    %45 = vector.extract_strided_slice %0 {offsets = [0, 6], sizes = [16, 1], strides = [1, 1]} : vector<16x8xi32> to vector<16x1xi32>
    %46 = vector.broadcast %45 : vector<16x1xi32> to vector<16x128xi32>
    %47 = arith.cmpi eq, %46, %1 : vector<16x128xi32>
    %cst_13 = arith.constant 1.000000e+00 : f32
    %cst_14 = arith.constant 0.000000e+00 : f32
    %48 = vector.broadcast %cst_13 : f32 to vector<16x128xf32>
    %49 = vector.broadcast %cst_14 : f32 to vector<16x128xf32>
    %50 = arith.select %47, %48, %49 : vector<16x128xi1>, vector<16x128xf32>
    %51 = arith.addf %44, %50 : vector<16x128xf32>
    %52 = vector.extract_strided_slice %0 {offsets = [0, 7], sizes = [16, 1], strides = [1, 1]} : vector<16x8xi32> to vector<16x1xi32>
    %53 = vector.broadcast %52 : vector<16x1xi32> to vector<16x128xi32>
    %54 = arith.cmpi eq, %53, %1 : vector<16x128xi32>
    %cst_15 = arith.constant 1.000000e+00 : f32
    %cst_16 = arith.constant 0.000000e+00 : f32
    %55 = vector.broadcast %cst_15 : f32 to vector<16x128xf32>
    %56 = vector.broadcast %cst_16 : f32 to vector<16x128xf32>
    %57 = arith.select %54, %55, %56 : vector<16x128xi1>, vector<16x128xf32>
    %58 = arith.addf %51, %57 : vector<16x128xf32>
    %59 = arith.truncf %58 : vector<16x128xf32> to vector<16x128xbf16>
    %c0_17 = arith.constant 0 : index
    %c0_18 = arith.constant 0 : index
    %60 = vector.load %arg3[%c0_17, %c0_18] : memref<128x32xbf16, #tpu.memory_space<vmem>>, vector<128x32xbf16>
    %cst_19 = arith.constant dense<0.000000e+00> : vector<16x32xf32>
    %61 = tpu.matmul %59, %60, %cst_19 {dimension_numbers = #tpu.dot_dimension_numbers<[1], [0], [0], [1], [0, 0, 1, 1], [], []>} : vector<16x128xbf16>, vector<128x32xbf16>, vector<16x32xf32> -> vector<16x32xf32>
    %62 = arith.truncf %61 : vector<16x32xf32> to vector<16x32xbf16>
    %c0_20 = arith.constant 0 : index
    %c0_21 = arith.constant 0 : index
    %63 = vector.load %arg4[%c0_20, %c0_21] : memref<32x32xbf16, #tpu.memory_space<vmem>>, vector<32x32xbf16>
    %cst_22 = arith.constant dense<0.000000e+00> : vector<16x32xf32>
    %64 = tpu.matmul %62, %63, %cst_22 {dimension_numbers = #tpu.dot_dimension_numbers<[1], [0], [0], [1], [0, 0, 1, 1], [], []>} : vector<16x32xbf16>, vector<32x32xbf16>, vector<16x32xf32> -> vector<16x32xf32>
    %c0_23 = arith.constant 0 : index
    %c0_24 = arith.constant 0 : index
    %65 = vector.load %arg2[%c0_23, %c0_24] : memref<160x16xbf16, #tpu.memory_space<vmem>>, vector<160x16xbf16>
    %c0_25 = arith.constant 0 : index
    %c0_26 = arith.constant 0 : index
    %66 = vector.load %arg5[%c0_25, %c0_26] : memref<16x32xbf16, #tpu.memory_space<vmem>>, vector<16x32xbf16>
    %cst_27 = arith.constant dense<0.000000e+00> : vector<160x32xf32>
    %67 = tpu.matmul %65, %66, %cst_27 {dimension_numbers = #tpu.dot_dimension_numbers<[1], [0], [0], [1], [0, 0, 1, 1], [], []>} : vector<160x16xbf16>, vector<16x32xbf16>, vector<160x32xf32> -> vector<160x32xf32>
    %68 = tpu.iota {dimensions = array<i32: 0>} : vector<160x16xi32>
    %69 = tpu.iota {dimensions = array<i32: 1>} : vector<160x16xi32>
    %c10_i32 = arith.constant 10 : i32
    %70 = vector.broadcast %c10_i32 : i32 to vector<160x16xi32>
    %71 = arith.muli %69, %70 : vector<160x16xi32>
    %72 = arith.cmpi sge, %68, %71 : vector<160x16xi32>
    %c1_i32 = arith.constant 1 : i32
    %73 = vector.broadcast %c1_i32 : i32 to vector<160x16xi32>
    %74 = arith.addi %69, %73 : vector<160x16xi32>
    %c10_i32_28 = arith.constant 10 : i32
    %75 = vector.broadcast %c10_i32_28 : i32 to vector<160x16xi32>
    %76 = arith.muli %74, %75 : vector<160x16xi32>
    %77 = arith.cmpi slt, %68, %76 : vector<160x16xi32>
    %78 = arith.andi %72, %77 : vector<160x16xi1>
    %cst_29 = arith.constant 1.000000e+00 : f32
    %cst_30 = arith.constant 0.000000e+00 : f32
    %79 = vector.broadcast %cst_29 : f32 to vector<160x16xf32>
    %80 = vector.broadcast %cst_30 : f32 to vector<160x16xf32>
    %81 = arith.select %78, %79, %80 : vector<160x16xi1>, vector<160x16xf32>
    %82 = arith.truncf %81 : vector<160x16xf32> to vector<160x16xbf16>
    %83 = arith.truncf %64 : vector<16x32xf32> to vector<16x32xbf16>
    %cst_31 = arith.constant dense<0.000000e+00> : vector<160x32xf32>
    %84 = tpu.matmul %82, %83, %cst_31 {dimension_numbers = #tpu.dot_dimension_numbers<[1], [0], [0], [1], [0, 0, 1, 1], [], []>} : vector<160x16xbf16>, vector<16x32xbf16>, vector<160x32xf32> -> vector<160x32xf32>
    %85 = arith.addf %67, %84 : vector<160x32xf32>
    %c0_32 = arith.constant 0 : index
    %c0_33 = arith.constant 0 : index
    %86 = vector.load %arg6[%c0_32, %c0_33] : memref<1x32xf32, #tpu.memory_space<vmem>>, vector<1x32xf32>
    %87 = vector.broadcast %86 : vector<1x32xf32> to vector<160x32xf32>
    %88 = arith.addf %85, %87 : vector<160x32xf32>
    %89 = math.tanh %88 : vector<160x32xf32>
    %90 = arith.truncf %89 : vector<160x32xf32> to vector<160x32xbf16>
    %c0_34 = arith.constant 0 : index
    %c0_35 = arith.constant 0 : index
    %91 = vector.load %arg7[%c0_34, %c0_35] : memref<32x128xbf16, #tpu.memory_space<vmem>>, vector<32x128xbf16>
    %cst_36 = arith.constant dense<0.000000e+00> : vector<160x128xf32>
    %92 = tpu.matmul %90, %91, %cst_36 {dimension_numbers = #tpu.dot_dimension_numbers<[1], [0], [0], [1], [0, 0, 1, 1], [], []>} : vector<160x32xbf16>, vector<32x128xbf16>, vector<160x128xf32> -> vector<160x128xf32>
    %c0_37 = arith.constant 0 : index
    %c0_38 = arith.constant 0 : index
    %93 = vector.load %arg8[%c0_37, %c0_38] : memref<1x128xf32, #tpu.memory_space<vmem>>, vector<1x128xf32>
    %94 = vector.broadcast %93 : vector<1x128xf32> to vector<160x128xf32>
    %95 = arith.addf %92, %94 : vector<160x128xf32>
    %c0_39 = arith.constant 0 : index
    %c0_40 = arith.constant 0 : index
    %96 = vector.load %arg9[%c0_39, %c0_40] : memref<160x128xf32, #tpu.memory_space<vmem>>, vector<160x128xf32>
    tpu.vector_store %arg9[%c0_39, %c0_40], %95 {strides = array<i32>} : memref<160x128xf32, #tpu.memory_space<vmem>>, vector<160x128xf32>,
    return
  }
  func.func @transform_0(%arg0: i32) -> (i32, i32) {
    %c0_i32 = arith.constant 0 : i32
    %c0_i32_0 = arith.constant 0 : i32
    return %arg0, %c0_i32 : i32, i32
  }
  func.func @transform_1(%arg0: i32) -> (i32, i32) {
    %c0_i32 = arith.constant 0 : i32
    %c0_i32_0 = arith.constant 0 : i32
    return %arg0, %c0_i32 : i32, i32
  }
  func.func @transform_2(%arg0: i32) -> (i32, i32) {
    %c0_i32 = arith.constant 0 : i32
    %c0_i32_0 = arith.constant 0 : i32
    %c0_i32_1 = arith.constant 0 : i32
    return %c0_i32, %c0_i32_0 : i32, i32
  }
  func.func @transform_3(%arg0: i32) -> (i32, i32) {
    %c0_i32 = arith.constant 0 : i32
    %c0_i32_0 = arith.constant 0 : i32
    %c0_i32_1 = arith.constant 0 : i32
    return %c0_i32, %c0_i32_0 : i32, i32
  }
  func.func @transform_4(%arg0: i32) -> (i32, i32) {
    %c0_i32 = arith.constant 0 : i32
    %c0_i32_0 = arith.constant 0 : i32
    %c0_i32_1 = arith.constant 0 : i32
    return %c0_i32, %c0_i32_0 : i32, i32
  }
  func.func @transform_5(%arg0: i32) -> (i32, i32) {
    %c0_i32 = arith.constant 0 : i32
    %c0_i32_0 = arith.constant 0 : i32
    %c0_i32_1 = arith.constant 0 : i32
    return %c0_i32, %c0_i32_0 : i32, i32
  }
  func.func @transform_6(%arg0: i32) -> (i32, i32) {
    %c0_i32 = arith.constant 0 : i32
    %c0_i32_0 = arith.constant 0 : i32
    %c0_i32_1 = arith.constant 0 : i32
    return %c0_i32, %c0_i32_0 : i32, i32
  }
  func.func @transform_7(%arg0: i32) -> (i32, i32) {
    %c0_i32 = arith.constant 0 : i32
    %c0_i32_0 = arith.constant 0 : i32
    %c0_i32_1 = arith.constant 0 : i32
    return %c0_i32, %c0_i32_0 : i32, i32
  }
  func.func @transform_8(%arg0: i32) -> (i32, i32) {
    %c0_i32 = arith.constant 0 : i32
    %c0_i32_0 = arith.constant 0 : i32
    return %arg0, %c0_i32 : i32, i32
  }
}

</mosaic_0001>

<bundles_post_ra>
// kernel: tpu_custom_call.1
= control target key start
LH: loop header
LB: loop body
LE: loop exit
PB: predicated region body
PF: predicated region fallthrough
CT: control target
= control target key end

     0   :  { %v1369_v1 = vmov 1   ;;  %v1370_v2 = vmov 0   ;;  %v1371_v4 = vmov 0.0   ;;  %v1372_v5 = vmov 2   ;;  %s1745_s0 = inlined_call_operand.vmem [shape: s32[16,8], index: 0, kind: input, shape index: {}]   ;;  %s1746_s1 = inlined_call_operand.vmem [shape: bf16[160,16], index: 1, kind: input, shape index: {}]   ;;  %s1747_s2 = inlined_call_operand.vmem [shape: bf16[128,32], index: 2, kind: input, shape index: {}]   ;;  %s1748_s3 = inlined_call_operand.vmem [shape: bf16[32,32], index: 3, kind: input, shape index: {}]   ;;  %s1749_s4 = inlined_call_operand.vmem [shape: bf16[16,32], index: 4, kind: input, shape index: {}]   ;;  %s1750_s5 = inlined_call_operand.vmem [shape: f32[1,32], index: 5, kind: input, shape index: {}]   ;;  %s1751_s6 = inlined_call_operand.vmem [shape: bf16[32,128], index: 6, kind: input, shape index: {}]   ;;  %s1752_s7 = inlined_call_operand.vmem [shape: f32[1,128], index: 7, kind: input, shape index: {}]   ;;  %s1753_s8 = inlined_call_operand.hbm [shape: f32[160,128], index: 8, kind: output, shape index: {}]  }
   0x1   :  { %v31_v0 = vld [vmem:[%s1745_s0] sm:$0xff]  ;;  %1270 = vset.pattern.permute.xlu1 %v1369_v1  ;;  %1269 = vset.pattern.permute.xlu0 %v1370_v2  ;;  %v32_v3 = vld [vmem:[%s1745_s0 + $0x8] sm:$0xff]  ;;  %v1373_v6 = vmov 3  }
   0x2   :  { %48 = vperm.xlu1 %1270, %v31_v0   ;;  %36 = vperm.xlu0 %1269, %v31_v0   ;;  %v1282_v7 = vld [vmem:[%s1747_s2] sm:$0xff]  }
   0x3   :  { %1140 = vmatprep.subr.bf16.mxu0 %v1371_v4 }
   0x6   :  { %51 = vperm.xlu1 %1270, %v32_v3   ;;  %39 = vperm.xlu0 %1269, %v32_v3  }
   0xa   :  { %1272 = vset.pattern.permute.xlu1 %v1372_v5  ;;  %1271 = vset.pattern.permute.xlu0 %v1372_v5 }
   0xb   :  { %63 = vperm.xlu1 %1272, %v32_v3   ;;  %60 = vperm.xlu0 %1271, %v31_v0  }
   0xf   :  { %1273 = vset.pattern.permute.xlu1 %v1373_v6  ;;  %1274 = vset.pattern.permute.xlu0 %v1373_v6 }
  0x10   :  { %72 = vperm.xlu1 %1273, %v31_v0   ;;  %75 = vperm.xlu0 %1274, %v32_v3  }
  0x11   :  { %13 = vsyncpa [#allocation3], 0  ;;  %1141 = vmatpush3.bf16.msra.mxu0 %v1282_v7  ;;  %v1374_v8 = vmov 4   ;;  %v1375_v9 = vmov 5   ;;  %v1283_v10 = vld [vmem:[%s1747_s2 + $0x8] sm:$0xff]   ;;  %v1376_v11 = vmov 6   ;;  %v33_v25 = vlaneseq }
  0x12   :  { %1142 = vmatprep.subr.bf16.mxu0 %v1371_v4  ;;  %v1284_v12 = vld [vmem:[%s1747_s2 + $0x10] sm:$0xff]   ;;  %v1285_v13 = vld [vmem:[%s1747_s2 + $0x18] sm:$0xff]   ;;  %v1377_v14 = vmov 7   ;;  %v1286_v15 = vld [vmem:[%s1747_s2 + $0x20] sm:$0xff]   ;;  %vm1378_vm0 = vmmov 0  }
  0x13   :  { %v1287_v16 = vld [vmem:[%s1747_s2 + $0x28] sm:$0xff]   ;;  %v1288_v17 = vld [vmem:[%s1747_s2 + $0x30] sm:$0xff]   ;;  %v1289_v18 = vld [vmem:[%s1747_s2 + $0x38] sm:$0xff]   ;;  %1156 = vmatprep.mubr.msk.bf16.mxu0 %vm1378_vm0, %v1371_v4  ;;  %v1469_v28 = vand.u32 127, %v33_v25 }
  0x14   :  { %1275 = vset.pattern.permute.xlu1 %v1374_v8  ;;  %1276 = vset.pattern.permute.xlu0 %v1375_v9  ;;  %v1291_v6 = vld [vmem:[%s1748_s3 + $0x8] sm:$0xff]  }
  0x15   :  { %84 = vperm.xlu1 %1275, %v31_v0   ;;  %96 = vperm.xlu0 %1276, %v31_v0  }
  0x16   :  { %1143 = vmatpush3.bf16.msra.mxu0 %v1283_v10 }
  0x17   :  { %1144 = vmatprep.subr.bf16.mxu0 %v1371_v4 }
  0x19   :  { %87 = vperm.xlu1 %1275, %v32_v3   ;;  %1279 = vset.pattern.permute.xlu0 %v1376_v11 }
  0x1a   :  { %111 = vperm.xlu0 %1279, %v32_v3   ;;  %1145 = vmatpush3.bf16.msra.mxu0 %v1284_v12  ;;  %v1514_v12 = vshrl.u32 %v33_v25, 7 }
  0x1b   :  { %1146 = vmatprep.subr.bf16.mxu0 %v1371_v4 }
  0x1c   :  { %v326_v25 = vadd.s32 32, %v1514_v12 }
  0x1d   :  { %1277 = vset.pattern.permute.xlu1 %v1375_v9 }
  0x1e   :  { %99 = vperm.xlu1 %1277, %v32_v3   ;;  %1281 = vset.pattern.permute.xlu0 %v1377_v14 }
  0x1f   :  { %1147 = vmatpush3.bf16.msra.mxu0 %v1285_v13  ;;  %v363_v13 = vadd.s32 1, %v1469_v28 }
  0x20   :  { %1148 = vmatprep.subr.bf16.mxu0 %v1371_v4 }
  0x22   :  { %1278 = vset.pattern.permute.xlu1 %v1376_v11 }
  0x23   :  { %108 = vperm.xlu1 %1278, %v31_v0   ;;  %1149 = vmatpush3.bf16.msra.mxu0 %v1286_v15  ;;  %v1519_v15 = vmul.u32 10, %v1469_v28 }
  0x24   :  { %1150 = vmatprep.subr.bf16.mxu0 %v1371_v4 }
  0x27   :  { %1280 = vset.pattern.permute.xlu1 %v1377_v14  ;;  %1151 = vmatpush3.bf16.msra.mxu0 %v1287_v16  ;;  %v323_v14 = vadd.s32 8, %v1514_v12  ;;  %v1521_v16 = vmul.u32 10, %v363_v13  ;;  %v1299_v13 = vld [vmem:[%s1746_s1 + $0x30] sm:$0xff]  }
  0x28   :  { %120 = vperm.xlu1 %1280, %v31_v0   ;;  %1152 = vmatprep.subr.bf16.mxu0 %v1371_v4 }
  0x2b   :  { %1153 = vmatpush3.bf16.msra.mxu0 %v1288_v17  ;;  %v324_v17 = vadd.s32 16, %v1514_v12 }
  0x2c   :  { %123 = vperm.xlu1 %1280, %v32_v3   ;;  %1154 = vmatprep.subr.bf16.mxu0 %v1371_v4  ;;  %v1290_v3 = vld [vmem:[%s1748_s3] sm:$0xff]  }
  0x2f   :  { %1155 = vmatpush3.bf16.msra.mxu0 %v1289_v18  ;;  %v325_v18 = vadd.s32 24, %v1514_v12 }
  0x30   :  { %1160 = vmatprep.subr.bf16.mxu0 %v1371_v4 }
  0x81   :  { %v49_v19 = vpop.permute.xlu1 %48  ;;  %v37_v21 = vpop.permute.xlu0 %36 }
  0x82   :  { %vm53_vm1 = vcmp.eq.s32.totalorder %v49_v19, %v1469_v28  ;;  %vm41_vm2 = vcmp.eq.s32.totalorder %v37_v21, %v1469_v28 }
  0x83   :  { %v55_v31 = vsel %vm53_vm1, 1.0, %v1371_v4  ;;  %v43_v32 = vsel %vm41_vm2, 1.0, %v1371_v4  ;;  %vm254_vm2 = vcmask 261120  }
  0x84   :  { %v57_v39 = vadd.f32 %v55_v31, %v43_v32 }
  0x85   :  { %v52_v20 = vpop.permute.xlu1 %51  ;;  %v40_v23 = vpop.permute.xlu0 %39 }
  0x86   :  { %vm54_vm3 = vcmp.eq.s32.totalorder %v52_v20, %v1469_v28  ;;  %vm42_vm4 = vcmp.eq.s32.totalorder %v40_v23, %v1469_v28 }
  0x87   :  { %v56_v33 = vsel %vm54_vm3, 1.0, %v1371_v4  ;;  %v44_v34 = vsel %vm42_vm4, 1.0, %v1371_v4  ;;  %vm344_vm3 = vcmp.ge.s32.totalorder %v323_v14, %v1519_v15  ;;  %vm365_vm4 = vcmp.lt.s32.totalorder %v1514_v12, %v1521_v16 }
  0x88   :  { %v58_v40 = vadd.f32 %v56_v33, %v44_v34 }
  0x8a   :  { %v64_v22 = vpop.permute.xlu1 %63  ;;  %v61_v27 = vpop.permute.xlu0 %60 }
  0x8b   :  { %vm66_vm5 = vcmp.eq.s32.totalorder %v64_v22, %v1469_v28  ;;  %vm65_vm6 = vcmp.eq.s32.totalorder %v61_v27, %v1469_v28  ;;  %v328_v27 = vadd.s32 48, %v1514_v12 }
  0x8c   :  { %v68_v36 = vsel %vm66_vm5, 1.0, %v1371_v4  ;;  %v67_v37 = vsel %vm65_vm6, 1.0, %v1371_v4  ;;  %vm366_vm5 = vcmp.lt.s32.totalorder %v323_v14, %v1521_v16  ;;  %v1300_v14 = vld [vmem:[%s1746_s1 + $0x38] sm:$0xff]  }
  0x8d   :  { %v70_v43 = vadd.f32 %v68_v36, %v58_v40  ;;  %v69_v44 = vadd.f32 %v67_v37, %v57_v39  ;;  %v331_v36 = vadd.s32 72, %v1514_v12  ;;  %v332_v37 = vadd.s32 80, %v1514_v12 }
  0x8f   :  { %v73_v24 = vpop.permute.xlu1 %72  ;;  %v76_v30 = vpop.permute.xlu0 %75 }
  0x90   :  { %vm77_vm7 = vcmp.eq.s32.totalorder %v73_v24, %v1469_v28  ;;  %vm78_vm8 = vcmp.eq.s32.totalorder %v76_v30, %v1469_v28 }
  0x91   :  { %v79_v41 = vsel %vm77_vm7, 1.0, %v1371_v4  ;;  %v80_v42 = vsel %vm78_vm8, 1.0, %v1371_v4  ;;  %vm345_vm7 = vcmp.ge.s32.totalorder %v324_v17, %v1519_v15  ;;  %vm346_vm8 = vcmp.ge.s32.totalorder %v325_v18, %v1519_v15 }
  0x92   :  { %v81_v49 = vadd.f32 %v79_v41, %v69_v44  ;;  %v82_v50 = vadd.f32 %v80_v42, %v70_v43 }
  0x94   :  { %v85_v26 = vpop.permute.xlu1 %84  ;;  %v97_v38 = vpop.permute.xlu0 %96 }
  0x95   :  { %vm89_vm9 = vcmp.eq.s32.totalorder %v85_v26, %v1469_v28  ;;  %vm101_vm12 = vcmp.eq.s32.totalorder %v97_v38, %v1469_v28  ;;  %v327_v26 = vadd.s32 40, %v1514_v12  ;;  %v333_v38 = vadd.s32 88, %v1514_v12 }
  0x96   :  { %v91_v46 = vsel %vm89_vm9, 1.0, %v1371_v4  ;;  %v103_v54 = vsel %vm101_vm12, 1.0, %v1371_v4  ;;  %vm367_vm9 = vcmp.lt.s32.totalorder %v324_v17, %v1521_v16  ;;  %vm436_vm12 = vcmask 130048   ;;  %v1303_v17 = vld [vmem:[%s1751_s6] sm:$0xff]  }
  0x97   :  { %v93_v52 = vadd.f32 %v91_v46, %v81_v49  ;;  %v335_v46 = vadd.s32 104, %v1514_v12 }
  0x98   :  { %v88_v29 = vpop.permute.xlu1 %87 }
  0x99   :  { %vm90_vm10 = vcmp.eq.s32.totalorder %v88_v29, %v1469_v28  ;;  %v112_v48 = vpop.permute.xlu0 %111  ;;  %v105_v59 = vadd.f32 %v103_v54, %v93_v52 }
  0x9a   :  { %v92_v47 = vsel %vm90_vm10, 1.0, %v1371_v4  ;;  %vm114_vm13 = vcmp.eq.s32.totalorder %v112_v48, %v1469_v28  ;;  %vm368_vm10 = vcmp.lt.s32.totalorder %v325_v18, %v1521_v16  ;;  %v337_v48 = vadd.s32 120, %v1514_v12  ;;  %v1304_v18 = vld [vmem:[%s1751_s6 + $0x8] sm:$0xff]   ;;  %s1379_s6 = smov [#allocation2]  }
  0x9b   :  { %v94_v53 = vadd.f32 %v92_v47, %v82_v50  ;;  %v116_v57 = vsel %vm114_vm13, 1.0, %v1371_v4  ;;  %vm387_vm13 = vmand %vm345_vm7, %vm367_vm9  ;;  %vm371_vm7 = vcmp.lt.s32.totalorder %v328_v27, %v1521_v16  ;;  %v336_v47 = vadd.s32 112, %v1514_v12 }
  0x9c   :  { %v1538_v22 = vsel %vm387_vm13, 1.0, %v1371_v4 }
  0x9d   :  { %v100_v35 = vpop.permute.xlu1 %99 }
  0x9e   :  { %vm102_vm11 = vcmp.eq.s32.totalorder %v100_v35, %v1469_v28  ;;  %v330_v35 = vadd.s32 64, %v1514_v12 }
  0x9f   :  { %v104_v51 = vsel %vm102_vm11, 1.0, %v1371_v4  ;;  %vm386_vm11 = vmand %vm344_vm3, %vm366_vm5  ;;  %vm370_vm3 = vcmp.lt.s32.totalorder %v327_v26, %v1521_v16  ;;  %vm349_vm5 = vcmp.ge.s32.totalorder %v328_v27, %v1519_v15 }
  0xa0   :  { %v106_v56 = vadd.f32 %v104_v51, %v94_v53  ;;  %v406_v20 = vsel %vm386_vm11, 1.0, %v1371_v4  ;;  %vm351_vm13 = vcmp.ge.s32.totalorder %v330_v35, %v1519_v15 }
  0xa2   :  { %v109_v45 = vpop.permute.xlu1 %108  ;;  %v118_v62 = vadd.f32 %v116_v57, %v106_v56  ;;  %v339_v56 = vadd.s32 136, %v1514_v12  ;;  %v340_v57 = vadd.s32 144, %v1514_v12 }
  0xa3   :  { %vm113_vm14 = vcmp.eq.s32.totalorder %v109_v45, %v1469_v28  ;;  %v334_v45 = vadd.s32 96, %v1514_v12 }
  0xa4   :  { %v115_v58 = vsel %vm113_vm14, 1.0, %v1371_v4  ;;  %vm388_vm14 = vmand %vm346_vm8, %vm368_vm10 }
  0xa5   :  { %v117_v63 = vadd.f32 %v115_v58, %v105_v59  ;;  %v1541_v23 = vsel %vm388_vm14, 1.0, %v1371_v4  ;;  %vm391_vm10 = vmand %vm349_vm5, %vm371_vm7  ;;  %vm352_vm14 = vcmp.ge.s32.totalorder %v331_v36, %v1519_v15  ;;  %vm375_vm5 = vcmp.lt.s32.totalorder %v332_v37, %v1521_v16 }
  0xa6   :  { %v426_v24 = vpack.c.bf16 %v1541_v23, %v1538_v22  ;;  %v1567_v32 = vsel %vm391_vm10, 1.0, %v1371_v4  ;;  %vm355_vm10 = vcmp.ge.s32.totalorder %v334_v45, %v1519_v15  ;;  %v341_v58 = vadd.s32 152, %v1514_v12 }
  0xa7   :  { %v121_v55 = vpop.permute.xlu1 %120 }
  0xa8   :  { %vm125_vm15 = vcmp.eq.s32.totalorder %v121_v55, %v1469_v28  ;;  %v338_v55 = vadd.s32 128, %v1514_v12 }
  0xa9   :  { %v127_v60 = vsel %vm125_vm15, 1.0, %v1371_v4  ;;  %vm347_vm15 = vcmp.ge.s32.totalorder %v326_v25, %v1519_v15 }
  0xaa   :  { %v129_v1 = vadd.f32 %v127_v60, %v117_v63 }
  0xab   :  { %v124_v61 = vpop.permute.xlu1 %123 }
  0xac   :  { %vm126_vm1 = vcmp.eq.s32.totalorder %v124_v61, %v1469_v28  ;;  %v329_v28 = vadd.s32 56, %v1514_v12 }
  0xad   :  { %v128_v0 = vsel %vm126_vm1, 1.0, %v1371_v4  ;;  %vm348_vm1 = vcmp.ge.s32.totalorder %v327_v26, %v1519_v15 }
  0xae   :  { %v130_v2 = vadd.f32 %v128_v0, %v118_v62  ;;  %vm372_vm8 = vcmp.lt.s32.totalorder %v329_v28, %v1521_v16  ;;  %vm390_vm9 = vmand %vm348_vm1, %vm370_vm3  ;;  %vm374_vm1 = vcmp.lt.s32.totalorder %v331_v36, %v1521_v16  ;;  %vm353_vm3 = vcmp.ge.s32.totalorder %v332_v37, %v1519_v15 }
  0xaf   :  { %v1562_v30 = vsel %vm390_vm9, 1.0, %v1371_v4  ;;  %vm394_vm7 = vmand %vm352_vm14, %vm374_vm1  ;;  %vm378_vm14 = vcmp.lt.s32.totalorder %v335_v46, %v1521_v16  ;;  %vm357_vm1 = vcmp.ge.s32.totalorder %v336_v47, %v1519_v15 }
  0xb0   :  { %v131_v5 = vpack.c.bf16 %v130_v2, %v129_v1  ;;  %v1590_v40 = vsel %vm394_vm7, 1.0, %v1371_v4 }
  0xb2   :  { %1157 = vmatmul.mubr.bf16.vlgmr.msra.gmra.mrb[0].mxu0 %v131_v5 }
  0xb3   :  { %1161 = vmatpush3.bf16.msra.mxu0 %v1290_v3  ;;  %1164 = vmatprep.mubr.msk.bf16.mxu0 %vm1378_vm0, %v1371_v4  ;;  %vm343_vm0 = vcmp.ge.s32.totalorder %v1514_v12, %v1519_v15  ;;  %v1298_v12 = vld [vmem:[%s1746_s1 + $0x28] sm:$0xff]  }
  0xb4   :  { %1162 = vmatprep.subr.bf16.mxu0 %v1371_v4  ;;  %vm385_vm6 = vmand %vm343_vm0, %vm365_vm4  ;;  %vm369_vm0 = vcmp.lt.s32.totalorder %v326_v25, %v1521_v16 }
  0xb5   :  { %v405_v19 = vsel %vm385_vm6, 1.0, %v1371_v4  ;;  %vm389_vm4 = vmand %vm347_vm15, %vm369_vm0  ;;  %vm350_vm6 = vcmp.ge.s32.totalorder %v329_v28, %v1519_v15  ;;  %vm373_vm15 = vcmp.lt.s32.totalorder %v330_v35, %v1521_v16 }
  0xb6   :  { %v425_v21 = vpack.c.bf16 %v406_v20, %v405_v19  ;;  %v1559_v29 = vsel %vm389_vm4, 1.0, %v1371_v4  ;;  %vm392_vm11 = vmand %vm350_vm6, %vm372_vm8  ;;  %vm354_vm4 = vcmp.ge.s32.totalorder %v333_v38, %v1519_v15  ;;  %vm376_vm6 = vcmp.lt.s32.totalorder %v333_v38, %v1521_v16  ;;  %v1698_v19 = vld [vmem:[%s1750_s5] ss:$0 sm:$0xff] }
  0xb7   :  { %1163 = vmatpush3.bf16.msra.mxu0 %v1291_v6  ;;  %v427_v31 = vpack.c.bf16 %v1562_v30, %v1559_v29  ;;  %v1570_v33 = vsel %vm392_vm11, 1.0, %v1371_v4  ;;  %vm393_vm0 = vmand %vm351_vm13, %vm373_vm15  ;;  %vm356_vm11 = vcmp.ge.s32.totalorder %v335_v46, %v1519_v15  ;;  %vm377_vm13 = vcmp.lt.s32.totalorder %v334_v45, %v1521_v16 }
  0xb8   :  { %1170 = vmatprep.mubr.msk.bf16.mxu1 %vm436_vm12, %v425_v21  ;;  %v428_v34 = vpack.c.bf16 %v1570_v33, %v1567_v32  ;;  %v1587_v39 = vsel %vm393_vm0, 1.0, %v1371_v4  ;;  %vm395_vm8 = vmand %vm353_vm3, %vm375_vm5  ;;  %vm358_vm0 = vcmp.ge.s32.totalorder %v337_v48, %v1519_v15  ;;  %vm379_vm3 = vcmp.lt.s32.totalorder %v336_v47, %v1521_v16  ;;  %1212 = vmatprep.subr.bf16.mxu0 %v1303_v17 }
  0xb9   :  { %v429_v41 = vpack.c.bf16 %v1590_v40, %v1587_v39  ;;  %vm396_vm9 = vmand %vm354_vm4, %vm376_vm6  ;;  %v415_v42 = vsel %vm395_vm8, 1.0, %v1371_v4  ;;  %vm380_vm4 = vcmp.lt.s32.totalorder %v337_v48, %v1521_v16  ;;  %vm359_vm8 = vcmp.ge.s32.totalorder %v338_v55, %v1519_v15 }
  0xba   :  { %v416_v43 = vsel %vm396_vm9, 1.0, %v1371_v4  ;;  %vm397_vm15 = vmand %vm355_vm10, %vm377_vm13  ;;  %vm360_vm9 = vcmp.ge.s32.totalorder %v339_v56, %v1519_v15  ;;  %vm381_vm10 = vcmp.lt.s32.totalorder %v338_v55, %v1521_v16 }
  0xbb   :  { %v430_v44 = vpack.c.bf16 %v416_v43, %v415_v42  ;;  %vm398_vm5 = vmand %vm356_vm11, %vm378_vm14  ;;  %v417_v49 = vsel %vm397_vm15, 1.0, %v1371_v4  ;;  %vm382_vm11 = vcmp.lt.s32.totalorder %v339_v56, %v1521_v16  ;;  %vm361_vm14 = vcmp.ge.s32.totalorder %v340_v57, %v1519_v15 }
  0xbc   :  { %v418_v50 = vsel %vm398_vm5, 1.0, %v1371_v4  ;;  %vm399_vm6 = vmand %vm357_vm1, %vm379_vm3  ;;  %vm362_vm15 = vcmp.ge.s32.totalorder %v341_v58, %v1519_v15  ;;  %vm383_vm1 = vcmp.lt.s32.totalorder %v340_v57, %v1521_v16  ;;  %v1301_v15 = vld [vmem:[%s1746_s1 + $0x40] sm:$0xff]  }
  0xbd   :  { %v431_v51 = vpack.c.bf16 %v418_v50, %v417_v49  ;;  %vm400_vm7 = vmand %vm358_vm0, %vm380_vm4  ;;  %v419_v52 = vsel %vm399_vm6, 1.0, %v1371_v4  ;;  %vm384_vm0 = vcmp.lt.s32.totalorder %v341_v58, %v1521_v16  ;;  %v1302_v16 = vld [vmem:[%s1746_s1 + $0x48] sm:$0xff]  }
  0xbe   :  { %v420_v53 = vsel %vm400_vm7, 1.0, %v1371_v4  ;;  %vm401_vm13 = vmand %vm359_vm8, %vm381_vm10 }
  0xbf   :  { %v432_v54 = vpack.c.bf16 %v420_v53, %v419_v52  ;;  %vm402_vm3 = vmand %vm360_vm9, %vm382_vm11  ;;  %v421_v59 = vsel %vm401_vm13, 1.0, %v1371_v4 }
  0xc0   :  { %v422_v60 = vsel %vm402_vm3, 1.0, %v1371_v4  ;;  %vm403_vm4 = vmand %vm361_vm14, %vm383_vm1 }
  0xc1   :  { %v433_v61 = vpack.c.bf16 %v422_v60, %v421_v59  ;;  %vm404_vm5 = vmand %vm362_vm15, %vm384_vm0  ;;  %v423_v62 = vsel %vm403_vm4, 1.0, %v1371_v4 }
  0xc2   :  { %v424_v63 = vsel %vm404_vm5, 1.0, %v1371_v4  ;;  %v1293_v4 = vld [vmem:[%s1746_s1] sm:$0xff]  }
  0xc3   :  { %v434_v0 = vpack.c.bf16 %v424_v63, %v423_v62 }
 0x185   :  { %v230_v7 = vpop.f32.mrb[0].mxu0 }
 0x186   :  { %v1158_v8 = vpop.f32.mrb[1].mxu0 }
 0x187   :  { %v233_v9 = vpop.f32.mrb[2].mxu0  ;;  %v1294_v8 = vld [vmem:[%s1746_s1 + $0x8] sm:$0xff]  }
 0x188   :  { %v237_v10 = vpack.c.bf16 %v233_v9, %v230_v7  ;;  %v1159_v11 = vpop.f32.mrb[3].mxu0  ;;  %v1292_v7 = vld [vmem:[%s1749_s4] sm:$0xff]   ;;  %v1295_v9 = vld [vmem:[%s1746_s1 + $0x10] sm:$0xff]  }
 0x189   :  { %v1297_v11 = vld [vmem:[%s1746_s1 + $0x20] sm:$0xff]  }
 0x18a   :  { %1165 = vmatmul.mubr.msk.bf16.vlgmr.msra.gmra.mrb[4].mxu0 %vm254_vm2, %v237_v10  ;;  %v1296_v10 = vld [vmem:[%s1746_s1 + $0x18] sm:$0xff]  }
 0x18b   :  { %1213 = vmatpush3.bf16.msra.mxu0 %v1303_v17 }
 0x18c   :  { %1214 = vmatprep.subr.bf16.mxu0 %v1304_v18 }
 0x18f   :  { %1215 = vmatpush3.bf16.msra.mxu0 %v1304_v18 }
 0x25d   :  { %v292_v1 = vpop.f32.mrb[4].mxu0 }
 0x25e   :  { %v1166_v2 = vpop.f32.mrb[5].mxu0 }
 0x25f   :  { %v295_v3 = vpop.f32.mrb[6].mxu0 }
 0x260   :  { %v435_v5 = vpack.c.bf16 %v295_v3, %v292_v1  ;;  %v1167_v6 = vpop.f32.mrb[7].mxu0 }
 0x262   :  { %1168 = vmatprep.subr.bf16.mxu1 %v435_v5 }
 0x263   :  { %1169 = vmatpush3.bf16.msra.mxu1 %v435_v5 }
 0x264   :  { %1190 = vmatprep.subr.bf16.mxu1 %v1292_v7 }
 0x266   :  { %1171 = vmatmul.mubr.msk.bf16.vlgmr.msra.gmra.mrb[0].mxu1 %vm436_vm12, %v426_v24 }
 0x267   :  { %1191 = vmatpush3.bf16.msra.mxu1 %v1292_v7  ;;  %1174 = vmatprep.mubr.msk.bf16.mxu1 %vm436_vm12, %v427_v31 }
 0x26e   :  { %1175 = vmatmul.mubr.msk.bf16.gmra.mrb[4].mxu1 %vm436_vm12, %v428_v34 }
 0x26f   :  { %1178 = vmatprep.mubr.msk.bf16.mxu1 %vm436_vm12, %v429_v41 }
 0x276   :  { %1179 = vmatmul.mubr.msk.bf16.gmra.mrb[8].mxu1 %vm436_vm12, %v430_v44 }
 0x277   :  { %1182 = vmatprep.mubr.msk.bf16.mxu1 %vm436_vm12, %v431_v51 }
 0x27e   :  { %1183 = vmatmul.mubr.msk.bf16.gmra.mrb[12].mxu1 %vm436_vm12, %v432_v54 }
 0x27f   :  { %1186 = vmatprep.mubr.msk.bf16.mxu1 %vm436_vm12, %v433_v61 }
 0x286   :  { %1187 = vmatmul.mubr.msk.bf16.gmra.mrb[16].mxu1 %vm436_vm12, %v434_v0 }
 0x287   :  { %1192 = vmatprep.mubr.msk.bf16.mxu1 %vm436_vm12, %v1293_v4 }
 0x28e   :  { %1193 = vmatmul.mubr.msk.bf16.vlgmr.msra.gmra.mrb[0].mxu1 %vm436_vm12, %v1294_v8 }
 0x28f   :  { %1196 = vmatprep.mubr.msk.bf16.mxu1 %vm436_vm12, %v1295_v9 }
 0x296   :  { %1197 = vmatmul.mubr.msk.bf16.gmra.mrb[4].mxu1 %vm436_vm12, %v1296_v10 }
 0x297   :  { %1200 = vmatprep.mubr.msk.bf16.mxu1 %vm436_vm12, %v1297_v11 }
 0x29e   :  { %1201 = vmatmul.mubr.msk.bf16.gmra.mrb[8].mxu1 %vm436_vm12, %v1298_v12 }
 0x29f   :  { %1204 = vmatprep.mubr.msk.bf16.mxu1 %vm436_vm12, %v1299_v13 }
 0x2a6   :  { %1205 = vmatmul.mubr.msk.bf16.gmra.mrb[12].mxu1 %vm436_vm12, %v1300_v14 }
 0x2a7   :  { %1208 = vmatprep.mubr.msk.bf16.mxu1 %vm436_vm12, %v1301_v15 }
 0x2ae   :  { %1209 = vmatmul.mubr.msk.bf16.gmra.mrb[16].mxu1 %vm436_vm12, %v1302_v16 }
 0x361   :  { %v1194_v20 = vpop.f32.mrb[0].mxu1 }
 0x362   :  { %v788_v21 = vadd.f32 %v1194_v20, %v1698_v19  ;;  %v700_v22 = vpop.f32.mrb[1].mxu1 }
 0x363   :  { %v786_v23 = vadd.f32 %v1698_v19, %v700_v22  ;;  %v1195_v24 = vpop.f32.mrb[2].mxu1 }
 0x364   :  { %1305 = vtanh.f32 %v788_v21  ;;  %v789_v25 = vadd.f32 %v1195_v24, %v1698_v19  ;;  %v703_v26 = vpop.f32.mrb[3].mxu1 }
 0x365   :  { %1307 = vtanh.f32 %v786_v23  ;;  %v787_v27 = vadd.f32 %v1698_v19, %v703_v26  ;;  %v1081_v26 = vld [vmem:[%s1752_s7] ss:$0 sm:$0xff]  ;;  %s1027_s7 = sshll.u32 %s1379_s6, 4  ;;  %s1028_s7 = int_to_ptr.vmem [resolvable:$true] %s1027_s7 }
 0x366   :  { %1309 = vtanh.f32 %v789_v25  ;;  %s1345_s4 = scalar_lea.vmem %s1028_s7, 2560  ;;  %p1350_p1 = scmp.lt.s32.totalorder %s1028_s7, %s1028_s7 }
 0x367   :  { %1311 = vtanh.f32 %v787_v27  ;;  %p1346_p0 = scmp.ne.s32.totalorder %s1028_s7, %s1345_s4  ;;  %p1351_p2 = scmp.lt.s32.totalorder %s1345_s4, %s1345_s4 }
 0x369   :  { %v1198_v28 = vpop.f32.mrb[4].mxu1  ;;  %p1352_p3 = por %p1351_p2, %p1350_p1 }
 0x36a   :  { %v792_v29 = vadd.f32 %v1198_v28, %v1698_v19  ;;  %v716_v30 = vpop.f32.mrb[5].mxu1 }
 0x36b   :  { %v790_v31 = vadd.f32 %v1698_v19, %v716_v30  ;;  %v1199_v32 = vpop.f32.mrb[6].mxu1  ;;  %p1353_p4 = pnand %p1352_p3, %p1346_p0 }
 0x36c   :  { %1313 = vtanh.f32 %v792_v29  ;;  %v793_v33 = vadd.f32 %v1199_v32, %v1698_v19  ;;  %v719_v34 = vpop.f32.mrb[7].mxu1 }
 0x36d   :  { %1315 = vtanh.f32 %v790_v31  ;;  %v791_v35 = vadd.f32 %v1698_v19, %v719_v34 }
 0x36e   :  { %v1306_v36 = vpop.eup %1305  ;;  %1317 = vtanh.f32 %v793_v33 }
 0x36f   :  { %v1308_v37 = vpop.eup %1307  ;;  %1319 = vtanh.f32 %v791_v35 }
 0x370   :  { %v1310_v38 = vpop.eup %1309 }
 0x371   :  { %v1312_v39 = vpop.eup %1311  ;;  %v1202_v40 = vpop.f32.mrb[8].mxu1  ;;  %v827_v41 = vpack.c.bf16 %v1310_v38, %v1306_v36 }
 0x372   :  { %v796_v42 = vadd.f32 %v1202_v40, %v1698_v19  ;;  %v732_v43 = vpop.f32.mrb[9].mxu1  ;;  %v826_v44 = vpack.c.bf16 %v1312_v39, %v1308_v37 }
 0x373   :  { %v794_v45 = vadd.f32 %v1698_v19, %v732_v43  ;;  %v1203_v46 = vpop.f32.mrb[10].mxu1 }
 0x374   :  { %1321 = vtanh.f32 %v796_v42  ;;  %v797_v47 = vadd.f32 %v1203_v46, %v1698_v19  ;;  %v735_v48 = vpop.f32.mrb[11].mxu1  ;;  %1216 = vmatprep.mubr.msk.bf16.mxu0 %vm254_vm2, %v826_v44 }
 0x375   :  { %1323 = vtanh.f32 %v794_v45  ;;  %v795_v49 = vadd.f32 %v1698_v19, %v735_v48  ;;  %1217 = vmatmul.mubr.msk.bf16.vlgmr.msra.gmra.mrb[8].mxu0 %vm254_vm2, %v827_v41 }
 0x376   :  { %v1314_v50 = vpop.eup %1313  ;;  %1325 = vtanh.f32 %v797_v47 }
 0x377   :  { %v1316_v51 = vpop.eup %1315  ;;  %1327 = vtanh.f32 %v795_v49 }
 0x378   :  { %v1318_v52 = vpop.eup %1317 }
 0x379   :  { %v1320_v53 = vpop.eup %1319  ;;  %v1206_v54 = vpop.f32.mrb[12].mxu1  ;;  %v829_v55 = vpack.c.bf16 %v1318_v52, %v1314_v50 }
 0x37a   :  { %v800_v56 = vadd.f32 %v1206_v54, %v1698_v19  ;;  %v748_v57 = vpop.f32.mrb[13].mxu1  ;;  %v828_v58 = vpack.c.bf16 %v1320_v53, %v1316_v51 }
 0x37b   :  { %v798_v59 = vadd.f32 %v1698_v19, %v748_v57  ;;  %v1207_v60 = vpop.f32.mrb[14].mxu1 }
 0x37c   :  { %1329 = vtanh.f32 %v800_v56  ;;  %v801_v61 = vadd.f32 %v1207_v60, %v1698_v19  ;;  %v751_v62 = vpop.f32.mrb[15].mxu1  ;;  %1220 = vmatprep.mubr.msk.bf16.mxu0 %vm254_vm2, %v828_v58 }
 0x37d   :  { %1331 = vtanh.f32 %v798_v59  ;;  %v799_v63 = vadd.f32 %v1698_v19, %v751_v62  ;;  %1221 = vmatmul.mubr.msk.bf16.gmra.mrb[12].mxu0 %vm254_vm2, %v829_v55 }
 0x37e   :  { %v1322_v0 = vpop.eup %1321  ;;  %1333 = vtanh.f32 %v801_v61 }
 0x37f   :  { %v1324_v1 = vpop.eup %1323  ;;  %1335 = vtanh.f32 %v799_v63 }
 0x380   :  { %v1326_v2 = vpop.eup %1325 }
 0x381   :  { %v1328_v3 = vpop.eup %1327  ;;  %v1210_v5 = vpop.f32.mrb[16].mxu1  ;;  %v831_v6 = vpack.c.bf16 %v1326_v2, %v1322_v0 }
 0x382   :  { %v804_v7 = vadd.f32 %v1210_v5, %v1698_v19  ;;  %v764_v4 = vpop.f32.mrb[17].mxu1  ;;  %v830_v8 = vpack.c.bf16 %v1328_v3, %v1324_v1 }
 0x383   :  { %v802_v9 = vadd.f32 %v1698_v19, %v764_v4  ;;  %v1211_v10 = vpop.f32.mrb[18].mxu1 }
 0x384   :  { %1337 = vtanh.f32 %v804_v7  ;;  %v805_v11 = vadd.f32 %v1211_v10, %v1698_v19  ;;  %v767_v12 = vpop.f32.mrb[19].mxu1  ;;  %1224 = vmatprep.mubr.msk.bf16.mxu0 %vm254_vm2, %v830_v8 }
 0x385   :  { %1339 = vtanh.f32 %v802_v9  ;;  %v803_v13 = vadd.f32 %v1698_v19, %v767_v12  ;;  %1225 = vmatmul.mubr.msk.bf16.gmra.mrb[16].mxu0 %vm254_vm2, %v831_v6 }
 0x386   :  { %v1330_v14 = vpop.eup %1329  ;;  %1341 = vtanh.f32 %v805_v11 }
 0x387   :  { %v1332_v15 = vpop.eup %1331  ;;  %1343 = vtanh.f32 %v803_v13 }
 0x388   :  { %v1334_v16 = vpop.eup %1333 }
 0x389   :  { %v1336_v17 = vpop.eup %1335  ;;  %v833_v18 = vpack.c.bf16 %v1334_v16, %v1330_v14 }
 0x38a   :  { %v832_v20 = vpack.c.bf16 %v1336_v17, %v1332_v15 }
 0x38c   :  { %1228 = vmatprep.mubr.msk.bf16.mxu0 %vm254_vm2, %v832_v20 }
 0x38d   :  { %1229 = vmatmul.mubr.msk.bf16.gmra.mrb[20].mxu0 %vm254_vm2, %v833_v18 }
 0x38e   :  { %v1338_v21 = vpop.eup %1337 }
 0x38f   :  { %v1340_v22 = vpop.eup %1339 }
 0x390   :  { %v1342_v23 = vpop.eup %1341 }
 0x391   :  { %v1344_v24 = vpop.eup %1343  ;;  %v835_v25 = vpack.c.bf16 %v1342_v23, %v1338_v21 }
 0x392   :  { %v834_v19 = vpack.c.bf16 %v1344_v24, %v1340_v22 }
 0x394   :  { %1232 = vmatprep.mubr.msk.bf16.mxu0 %vm254_vm2, %v834_v19 }
 0x395   :  { %1233 = vmatmul.mubr.msk.bf16.gmra.mrb[24].mxu0 %vm254_vm2, %v835_v25 }
 0x448   :  { %v1218_v27 = vpop.f32.mrb[8].mxu0 }
 0x449   :  { %v932_v28 = vadd.f32 %v1218_v27, %v1081_v26  ;;  %v923_v29 = vpop.f32.mrb[9].mxu0 }
 0x44a   :  { %v924_v30 = vadd.f32 %v1081_v26, %v923_v29  ;;  %v1219_v31 = vpop.f32.mrb[10].mxu0 }
 0x44b   :  { %1004 = vst [vmem:[#allocation2 + $0x10] sm:$0xff] %v932_v28  ;;  %v935_v32 = vadd.f32 %v1219_v31, %v1081_v26  ;;  %v926_v33 = vpop.f32.mrb[11].mxu0 }
 0x44c   :  { %1002 = vst [vmem:[#allocation2] sm:$0xff] %v924_v30  ;;  %v927_v34 = vadd.f32 %v1081_v26, %v926_v33 }
 0x44d   :  { %1005 = vst [vmem:[#allocation2 + $0x18] sm:$0xff] %v935_v32 }
 0x44e   :  { %1003 = vst [vmem:[#allocation2 + $0x8] sm:$0xff] %v927_v34 }
 0x450   :  { %v1222_v35 = vpop.f32.mrb[12].mxu0 }
 0x451   :  { %v948_v36 = vadd.f32 %v1222_v35, %v1081_v26  ;;  %v939_v37 = vpop.f32.mrb[13].mxu0 }
 0x452   :  { %v940_v38 = vadd.f32 %v1081_v26, %v939_v37  ;;  %v1223_v39 = vpop.f32.mrb[14].mxu0 }
 0x453   :  { %1008 = vst [vmem:[#allocation2 + $0x30] sm:$0xff] %v948_v36  ;;  %v951_v40 = vadd.f32 %v1223_v39, %v1081_v26  ;;  %v942_v41 = vpop.f32.mrb[15].mxu0 }
 0x454   :  { %1006 = vst [vmem:[#allocation2 + $0x20] sm:$0xff] %v940_v38  ;;  %v943_v42 = vadd.f32 %v1081_v26, %v942_v41 }
 0x455   :  { %1009 = vst [vmem:[#allocation2 + $0x38] sm:$0xff] %v951_v40 }
 0x456   :  { %1007 = vst [vmem:[#allocation2 + $0x28] sm:$0xff] %v943_v42 }
 0x458   :  { %v1226_v43 = vpop.f32.mrb[16].mxu0 }
 0x459   :  { %v964_v44 = vadd.f32 %v1226_v43, %v1081_v26  ;;  %v955_v45 = vpop.f32.mrb[17].mxu0 }
 0x45a   :  { %v956_v46 = vadd.f32 %v1081_v26, %v955_v45  ;;  %v1227_v47 = vpop.f32.mrb[18].mxu0 }
 0x45b   :  { %1012 = vst [vmem:[#allocation2 + $0x50] sm:$0xff] %v964_v44  ;;  %v967_v48 = vadd.f32 %v1227_v47, %v1081_v26  ;;  %v958_v49 = vpop.f32.mrb[19].mxu0 }
 0x45c   :  { %1010 = vst [vmem:[#allocation2 + $0x40] sm:$0xff] %v956_v46  ;;  %v959_v50 = vadd.f32 %v1081_v26, %v958_v49 }
 0x45d   :  { %1013 = vst [vmem:[#allocation2 + $0x58] sm:$0xff] %v967_v48 }
 0x45e   :  { %1011 = vst [vmem:[#allocation2 + $0x48] sm:$0xff] %v959_v50 }
 0x460   :  { %v1230_v51 = vpop.f32.mrb[20].mxu0 }
 0x461   :  { %v980_v52 = vadd.f32 %v1230_v51, %v1081_v26  ;;  %v971_v53 = vpop.f32.mrb[21].mxu0 }
 0x462   :  { %v972_v54 = vadd.f32 %v1081_v26, %v971_v53  ;;  %v1231_v55 = vpop.f32.mrb[22].mxu0 }
 0x463   :  { %1016 = vst [vmem:[#allocation2 + $0x70] sm:$0xff] %v980_v52  ;;  %v983_v56 = vadd.f32 %v1231_v55, %v1081_v26  ;;  %v974_v57 = vpop.f32.mrb[23].mxu0 }
 0x464   :  { %1014 = vst [vmem:[#allocation2 + $0x60] sm:$0xff] %v972_v54  ;;  %v975_v58 = vadd.f32 %v1081_v26, %v974_v57 }
 0x465   :  { %1017 = vst [vmem:[#allocation2 + $0x78] sm:$0xff] %v983_v56 }
 0x466   :  { %1015 = vst [vmem:[#allocation2 + $0x68] sm:$0xff] %v975_v58 }
 0x468   :  { %v1234_v59 = vpop.f32.mrb[24].mxu0 }
 0x469   :  { %v996_v60 = vadd.f32 %v1234_v59, %v1081_v26  ;;  %v987_v61 = vpop.f32.mrb[25].mxu0 }
 0x46a   :  { %v988_v62 = vadd.f32 %v1081_v26, %v987_v61  ;;  %v1235_v63 = vpop.f32.mrb[26].mxu0 }
 0x46b   :  { %1020 = vst [vmem:[#allocation2 + $0x90] sm:$0xff] %v996_v60  ;;  %v999_v0 = vadd.f32 %v1235_v63, %v1081_v26  ;;  %v990_v1 = vpop.f32.mrb[27].mxu0 }
 0x46c   :  { %1018 = vst [vmem:[#allocation2 + $0x80] sm:$0xff] %v988_v62  ;;  %v991_v2 = vadd.f32 %v1081_v26, %v990_v1 }
 0x46d   :  { %1021 = vst [vmem:[#allocation2 + $0x98] sm:$0xff] %v999_v0 }
 0x46e   :  { %1019 = vst [vmem:[#allocation2 + $0x88] sm:$0xff] %v991_v2 }
 0x46f   :  { %1356 = shalt.err (!%p1353_p4)
}
 0x470   :  { %s1357_s30 = scalar_lea.hbm %s1753_s8, 2560 }
 0x471   :  { %p1358_p5 = scmp.ne.s32.totalorder %s1753_s8, %s1357_s30  ;;  %p1361_p6 = scmp.lt.u32.totalorder %s1357_s30, %s1753_s8 }
 0x473   :  { %p1363_p7 = pnand %p1361_p6, %p1358_p5 }
 0x475   :  { %1366 = shalt.err (!%p1363_p7)
}
 0x476   :  { %s1380_s12 = smov 128   ;;  %s1381_s13 = smov 8  }
 0x477   :  { %1033 = dma.vmem_to_hbm [thread:$0]  %s1028_s7, 2560, %s1753_s8, [#allocation3], %s1380_s12, %s1380_s12, %s1381_s13  }
 0x478   :  { %1367 = dma.done.wait [#allocation3], 2560  }
 0x479   :  { %1368 = vsyncadd [#allocation3], 4294964736 }
 0x47a   :  { %1037 = vsyncpa [#allocation3], 1 }

</bundles_post_ra>
